<compile_context>
chip_gen: v7x
topology: tpu7x:2x2x1
jax: 0.10.0
libtpu: 0.0.40
codegen_flags: <defaults>
</compile_context>

<pallas_src>
import functools

import jax
import jax.numpy as jnp
from jax.experimental import pallas as pl
from jax.experimental.pallas import tpu as pltpu


C_PAD = 128                      # lane-dense channel padding (multiple of 128 lanes)
SRC_RESIDENT_BYTES = 4 * 1024 * 1024   # keep x_src fully VMEM-resident below this size


def _round_up(n, m):
    return ((n + m - 1) // m) * m


# ----------------------------- Pallas kernel -------------------------------------

def _sage_layer_kernel(a_ref, xs_ref, xd_ref, w_ref, b_ref, dinv_ref,
                       o_ref, acc_ref, *, tile_k, src_resident):
    """One fused SAGEConv + ReLU layer tile.

    grid = (dst tiles [parallel], src tiles [arbitrary / reduction])
    a_ref   : [tm, tk]            int8  edge-count adjacency tile (unnormalized)
    xs_ref  : [tk, C] or [Ns, C]  bf16  source-node features (tiled or VMEM-resident)
    xd_ref  : [tm, C]             bf16  dst-node features (zero-padded past n_dst)
    w_ref   : [2C, C]             bf16  stacked [W_l; W_r] (pre-transposed, zero-padded)
    b_ref   : [1, C]              f32   bias (zero-padded)
    dinv_ref: [tm, 1]             f32   1 / max(deg, 1) per dst row
    o_ref   : [tm, C]             bf16 (intermediate) or f32 (last layer)
    acc_ref : [tm, C]             f32   VMEM accumulator scratch
    """
    k = pl.program_id(1)

    @pl.when(k == 0)
    def _init():
        acc_ref[...] = jnp.zeros_like(acc_ref)

    # int8 counts -> bf16 on the VPU (free in the HBM-bound regime), then MXU matmul
    # with f32 accumulation.  Go via f32 for a conservative conversion path.
    a = a_ref[...].astype(jnp.float32).astype(jnp.bfloat16)
    if src_resident:
        start = pl.multiple_of(k * tile_k, tile_k)
        xs = xs_ref[pl.ds(start, tile_k), :]
    else:
        xs = xs_ref[...]
    acc_ref[...] += jnp.dot(a, xs, preferred_element_type=jnp.float32)

    @pl.when(k == pl.num_programs(1) - 1)
    def _epilogue():
        # mean = (sum of neighbor features) * 1/deg, folded here instead of into A.
        agg = (acc_ref[...] * dinv_ref[...]).astype(jnp.bfloat16)
        # single K=2*C_PAD matmul against the stacked [W_l; W_r] weight.
        both = jnp.concatenate([agg, xd_ref[...]], axis=1)
        h = jnp.dot(both, w_ref[...], preferred_element_type=jnp.float32)
        h = h + b_ref[...]
        o_ref[...] = jnp.maximum(h, 0.0).astype(o_ref.dtype)   # fused ReLU


def sage_conv_relu(a_counts, x_src, x_dst, inv_deg, w_stacked, bias,
                   *, tile_m, tile_k, out_dtype):
    """One SAGEConv layer + ReLU as a single tiled pallas_call.

    a_counts: [n_dst_pad, n_src_pad] int8  edge counts (duplicates accumulate)
    x_src:    [n_src_pad, C_PAD]     bf16  source-node features
    x_dst:    [n_dst_pad, C_PAD]     bf16  dst-node features (zero-padded past n_dst)
    inv_deg:  [n_dst_pad, 1]         f32   1 / max(deg, 1)
    w_stacked:[2*C_PAD, C_PAD]       bf16  [W_l; W_r] pre-transposed, zero-padded
    bias:     [1, C_PAD]             f32
    returns   [n_dst_pad, C_PAD]     out_dtype
    """
    n_dst_pad, n_src_pad = a_counts.shape
    c_pad = x_src.shape[1]
    grid = (n_dst_pad // tile_m, n_src_pad // tile_k)

    src_resident = (n_src_pad * c_pad * 2) <= SRC_RESIDENT_BYTES
    if src_resident:
        # constant block index -> DMA'd once, stays VMEM-resident across all dst tiles
        xs_spec = pl.BlockSpec((n_src_pad, c_pad), lambda i, k: (0, 0))
    else:
        xs_spec = pl.BlockSpec((tile_k, c_pad), lambda i, k: (k, 0))

    kernel = functools.partial(_sage_layer_kernel, tile_k=tile_k,
                               src_resident=src_resident)

    return pl.pallas_call(
        kernel,
        out_shape=jax.ShapeDtypeStruct((n_dst_pad, c_pad), out_dtype),
        grid_spec=pltpu.PrefetchScalarGridSpec(
            num_scalar_prefetch=0,
            grid=grid,
            in_specs=[
                pl.BlockSpec((tile_m, tile_k), lambda i, k: (i, k)),     # A (int8)
                xs_spec,                                                 # x_src
                pl.BlockSpec((tile_m, c_pad), lambda i, k: (i, 0)),      # x_dst
                pl.BlockSpec((2 * c_pad, c_pad), lambda i, k: (0, 0)),   # [W_l; W_r]
                pl.BlockSpec((1, c_pad), lambda i, k: (0, 0)),           # bias
                pl.BlockSpec((tile_m, 1), lambda i, k: (i, 0)),          # 1/deg
            ],
            out_specs=pl.BlockSpec((tile_m, c_pad), lambda i, k: (i, 0)),
            scratch_shapes=[pltpu.VMEM((tile_m, c_pad), jnp.float32)],
        ),
        compiler_params=pltpu.CompilerParams(
            dimension_semantics=("parallel", "arbitrary"),
            vmem_limit_bytes=32 * 1024 * 1024,   # ample for these tiles on v5e/v6e/v7x
        ),
    )(a_counts, x_src, x_dst, w_stacked, bias, inv_deg)


# ------------------------------- JAX glue -----------------------------------------

def build_adjacency(edge_index, n_dst_pad, n_src_pad):
    """Edge-count matrix A[dst, src] in int8 (ONE scatter at final dtype) + 1/deg."""
    src = edge_index[0].astype(jnp.int32)
    dst = edge_index[1].astype(jnp.int32)
    a = jnp.zeros((n_dst_pad, n_src_pad), jnp.int8).at[dst, src].add(jnp.int8(1))
    # degree over the E-sized edge list, not a dense row-sum over A
    deg = jax.ops.segment_sum(jnp.ones_like(dst, jnp.float32), dst,
                              num_segments=n_dst_pad)
    inv_deg = (1.0 / jnp.maximum(deg, 1.0)).reshape(n_dst_pad, 1)
    return a, inv_deg


def init_sage_params(key, c_in, c_out):
    assert c_in <= C_PAD and c_out <= C_PAD
    k_l, k_r, k_b = jax.random.split(key, 3)
    scale = 1.0 / jnp.sqrt(jnp.float32(c_in))
    w_l = jax.random.normal(k_l, (c_in, c_out), jnp.float32) * scale
    w_r = jax.random.normal(k_r, (c_in, c_out), jnp.float32) * scale
    b = jax.random.uniform(k_b, (c_out,), jnp.float32, -0.1, 0.1)
    # fused [W_l; W_r]: rows [0, C_PAD) multiply the aggregated-neighbor half,
    # rows [C_PAD, 2*C_PAD) multiply the root (x_dst) half.  Zero-padded -> inert.
    w = jnp.zeros((2 * C_PAD, C_PAD), jnp.bfloat16)
    w = w.at[:c_in, :c_out].set(w_l.astype(jnp.bfloat16))
    w = w.at[C_PAD:C_PAD + c_in, :c_out].set(w_r.astype(jnp.bfloat16))
    b_p = jnp.zeros((1, C_PAD), jnp.float32).at[0, :c_out].set(b)
    return dict(w=w, b=b_p,
                w_l_f32=w_l, w_r_f32=w_r, b_f32=b,
                c_in=c_in, c_out=c_out)


def init_encoder_params(key, in_channels, out_channels, k=2):
    keys = jax.random.split(key, k)
    params = []
    if k == 1:
        params.append(init_sage_params(keys[0], in_channels, out_channels))
    else:
        params.append(init_sage_params(keys[0], in_channels, 2 * out_channels))
        for i in range(1, k - 1):
            params.append(init_sage_params(keys[i], 2 * out_channels, 2 * out_channels))
        params.append(init_sage_params(keys[k - 1], 2 * out_channels, out_channels))
    return params


@functools.partial(jax.jit,
                   static_argnames=("sizes", "out_dims", "k", "tile_m", "tile_k"))
def _encoder_forward_impl(x, edge_indices, weights, *, sizes, out_dims, k,
                          tile_m, tile_k):
    n0, c0 = x.shape
    # one lane-dense channel pad, bf16, for the whole stack
    x_p = jnp.zeros((n0, C_PAD), jnp.bfloat16).at[:, :c0].set(x.astype(jnp.bfloat16))

    n_layers = min(k, len(sizes))
    out = None
    last_n_dst, last_c_out = n0, c0
    for i in range(n_layers):
        edge_index = edge_indices[i]
        n_src, n_dst = sizes[i]
        w_stacked, bias = weights[i]
        last_layer = (i == n_layers - 1)

        # dst tile: multiple of 32 (int8 sublane packing of A); src tile: multiple of 128
        tm = min(tile_m, _round_up(n_dst, 32))
        n_dst_pad = _round_up(n_dst, tm)
        # keep >= 2 dst tiles when possible so the "parallel" axis can shard across
        # v7x's two TensorCores (irrelevant on single-TC v5e/v6e).
        if n_dst_pad // tm < 2 and tm > 32:
            tm = max(32, _round_up(tm // 2, 32))
            n_dst_pad = _round_up(n_dst, tm)
        tk = min(tile_k, _round_up(n_src, 128))
        n_src_pad = _round_up(n_src, tk)

        # source-node features at padded row count (extra rows inert: A columns zero)
        if x_p.shape[0] >= n_src_pad:
            x_src = x_p[:n_src_pad]
        else:
            x_src = jnp.zeros((n_src_pad, C_PAD), jnp.bfloat16).at[: x_p.shape[0]].set(x_p)

        # dst-node features: first n_dst frontier rows, zero-padded (padded rows stay
        # deterministic -> no garbage leaks into the padded output rows)
        x_dst = jnp.zeros((n_dst_pad, C_PAD), jnp.bfloat16).at[:n_dst].set(x_src[:n_dst])

        a_counts, inv_deg = build_adjacency(edge_index, n_dst_pad, n_src_pad)

        out = sage_conv_relu(
            a_counts, x_src, x_dst, inv_deg, w_stacked, bias,
            tile_m=tm, tile_k=tk,
            out_dtype=jnp.float32 if last_layer else jnp.bfloat16)

        x_p = out                 # bf16 for intermediate layers -> no extra cast pass
        last_n_dst, last_c_out = n_dst, out_dims[i]

    if out is None:
        return x
    return out[:last_n_dst, :last_c_out]


def encoder_forward(x, adjs, params, k=2, *, tile_m=512, tile_k=1024):
    """Mirrors Encoder.forward for a plain-tensor `x`; activation = ReLU.

    adjs: list of (edge_index[2, E], size=(n_src, n_dst)) per layer.
    Note: for a plain tensor x, the `i >= 1 and i < k-1` branch of the PyTorch code
    performs the same conv call (no residual), so a single path suffices.
    """
    edge_indices = tuple(e for e, _ in adjs)
    sizes = tuple((int(s[0]), int(s[1])) for _, s in adjs)
    weights = tuple((p["w"], p["b"]) for p in params)
    out_dims = tuple(int(p["c_out"]) for p in params)
    return _encoder_forward_impl(x, edge_indices, weights,
                                 sizes=sizes, out_dims=out_dims, k=k,
                                 tile_m=tile_m, tile_k=tile_k)


def encoder_forward_ref(x, adjs, params, k=2):
    """Pure-JAX f32 reference (no Pallas) for a numerical sanity check."""
    for i, (edge_index, size) in enumerate(adjs):
        if i <= k - 1:
            n_src, n_dst = size
            src, dst = edge_index[0], edge_index[1]
            a = jnp.zeros((n_dst, n_src), jnp.float32).at[dst, src].add(1.0)
            a = a / jnp.maximum(a.sum(axis=1, keepdims=True), 1.0)
            p = params[i]
            h = (a @ x) @ p["w_l_f32"] + p["b_f32"] + x[:n_dst] @ p["w_r_f32"]
            x = jnp.maximum(h, 0.0)
    return x


# --------------------------------- main --------------------------------------------

if __name__ == "__main__":
    key = jax.random.PRNGKey(0)
    k_x, k_e0, k_e1, k_p = jax.random.split(key, 4)

    in_channels = 16
    out_channels = 8
    k_layers = 2

    # neighbor-sampled bipartite blocks: layer 0: 32 -> 16 nodes, layer 1: 16 -> 8 nodes
    n0_src, n0_dst = 32, 16
    n1_src, n1_dst = 16, 8
    fanout = 4

    x = jax.random.normal(k_x, (n0_src, in_channels), jnp.float32)

    dst0 = jnp.repeat(jnp.arange(n0_dst, dtype=jnp.int32), fanout)
    src0 = jax.random.randint(k_e0, (n0_dst * fanout,), 0, n0_src, dtype=jnp.int32)
    edge_index0 = jnp.stack([src0, dst0])

    dst1 = jnp.repeat(jnp.arange(n1_dst, dtype=jnp.int32), fanout)
    src1 = jax.random.randint(k_e1, (n1_dst * fanout,), 0, n1_src, dtype=jnp.int32)
    edge_index1 = jnp.stack([src1, dst1])

    adjs = [(edge_index0, (n0_src, n0_dst)), (edge_index1, (n1_src, n1_dst))]

    params = init_encoder_params(k_p, in_channels, out_channels, k=k_layers)

    out = encoder_forward(x, adjs, params, k=k_layers)
    out = jax.block_until_ready(out)

    assert out.shape == (n1_dst, out_channels), out.shape
    assert out.dtype == jnp.float32
    assert bool(jnp.all(jnp.isfinite(out)))

    # numerical check against the pure-JAX f32 reference (bf16 MXU inputs -> loose tol)
    ref = encoder_forward_ref(x, adjs, params, k=k_layers)
    err = float(jnp.max(jnp.abs(out - ref)))
    assert bool(jnp.allclose(out, ref, rtol=1e-1, atol=1e-1)), err

    print("KERNEL_OK")
</pallas_src>

<mosaic_0001>
module attributes {stable_mosaic.version = 11 : i64} {
  func.func private @main(%arg0: i32) attributes {dimension_semantics = [#tpu.dimension_semantics<core_parallel>], iteration_bounds = array<i64: 2>, tpu.core_type = #tpu.core_type<sc_scalar_subcore>, window_params = []} {
    return
  }
}

module attributes {stable_mosaic.version = 11 : i64} {
  func.func private @main(%arg0: i32) attributes {dimension_semantics = [#tpu.dimension_semantics<core_parallel>], iteration_bounds = array<i64: 2>, tpu.core_type = #tpu.core_type<sc_scalar_subcore>, window_params = []} {
    return
  }
}

module attributes {stable_mosaic.version = 11 : i64} {
  func.func @_sage_layer_kernel(%arg0: i32, %arg1: i32, %arg2: memref<32x128xi8, #tpu.memory_space<vmem>>, %arg3: memref<128x128xbf16, #tpu.memory_space<vmem>>, %arg4: memref<32x128xbf16, #tpu.memory_space<vmem>>, %arg5: memref<256x128xbf16, #tpu.memory_space<vmem>>, %arg6: memref<1x128xf32, #tpu.memory_space<vmem>>, %arg7: memref<32x1xf32, #tpu.memory_space<vmem>>, %arg8: memref<32x128xbf16, #tpu.memory_space<vmem>>, %arg9: memref<32x128xf32, #tpu.memory_space<vmem>>) attributes {dimension_semantics = [#tpu.dimension_semantics<parallel>, #tpu.dimension_semantics<arbitrary>], iteration_bounds = array<i64: 1, 1>, scalar_prefetch = 0 : i64, scratch_operands = 1 : i64, tpu.core_type = #tpu.core_type<tc>, window_params = [{transform_indices = @transform_0, window_bounds = array<i64: 32, 128>}, {pipeline_mode = #tpu.pipeline_mode<synchronous>, transform_indices = @transform_1, window_bounds = array<i64: 128, 128>}, {transform_indices = @transform_2, window_bounds = array<i64: 32, 128>}, {pipeline_mode = #tpu.pipeline_mode<synchronous>, transform_indices = @transform_3, window_bounds = array<i64: 256, 128>}, {pipeline_mode = #tpu.pipeline_mode<synchronous>, transform_indices = @transform_4, window_bounds = array<i64: 1, 128>}, {transform_indices = @transform_5, window_bounds = array<i64: 32, 1>}, {transform_indices = @transform_6, window_bounds = array<i64: 32, 128>}]} {
    %c0_i32 = arith.constant 0 : i32
    %0 = arith.cmpi eq, %arg1, %c0_i32 : i32
    %1 = arith.extui %0 : i1 to i32
    %c0_i32_0 = arith.constant 0 : i32
    %2 = arith.cmpi ne, %1, %c0_i32_0 : i32
    scf.if %2 {
      %cst_9 = arith.constant 0.000000e+00 : f32
      %17 = vector.broadcast %cst_9 : f32 to vector<32x128xf32>
      %c0_10 = arith.constant 0 : index
      %c0_11 = arith.constant 0 : index
      %18 = vector.load %arg9[%c0_10, %c0_11] : memref<32x128xf32, #tpu.memory_space<vmem>>, vector<32x128xf32>
      tpu.vector_store %arg9[%c0_10, %c0_11], %17 {strides = array<i32>} : memref<32x128xf32, #tpu.memory_space<vmem>>, vector<32x128xf32>,
    } else {
    }
    %c0 = arith.constant 0 : index
    %c0_1 = arith.constant 0 : index
    %3 = vector.load %arg2[%c0, %c0_1] : memref<32x128xi8, #tpu.memory_space<vmem>>, vector<32x128xi8>
    %4 = arith.sitofp %3 : vector<32x128xi8> to vector<32x128xf32>
    %5 = arith.truncf %4 : vector<32x128xf32> to vector<32x128xbf16>
    %c128_i32 = arith.constant 128 : i32
    %6 = arith.muli %arg1, %c128_i32 : i32
    %7 = tpu.assume_multiple %6, 128 : i32
    %8 = arith.index_cast %7 : i32 to index
    %c0_2 = arith.constant 0 : index
    %9 = vector.load %arg3[%8, %c0_2] : memref<128x128xbf16, #tpu.memory_space<vmem>>, vector<128x128xbf16>
    %c0_3 = arith.constant 0 : index
    %c0_4 = arith.constant 0 : index
    %10 = vector.load %arg9[%c0_3, %c0_4] : memref<32x128xf32, #tpu.memory_space<vmem>>, vector<32x128xf32>
    %cst = arith.constant dense<0.000000e+00> : vector<32x128xf32>
    %11 = tpu.matmul %5, %9, %cst {dimension_numbers = #tpu.dot_dimension_numbers<[1], [0], [0], [1], [0, 0, 1, 1], [], []>} : vector<32x128xbf16>, vector<128x128xbf16>, vector<32x128xf32> -> vector<32x128xf32>
    %12 = arith.addf %10, %11 : vector<32x128xf32>
    %c0_5 = arith.constant 0 : index
    %c0_6 = arith.constant 0 : index
    %13 = vector.load %arg9[%c0_5, %c0_6] : memref<32x128xf32, #tpu.memory_space<vmem>>, vector<32x128xf32>
    tpu.vector_store %arg9[%c0_5, %c0_6], %12 {strides = array<i32>} : memref<32x128xf32, #tpu.memory_space<vmem>>, vector<32x128xf32>,
    %c0_i32_7 = arith.constant 0 : i32
    %14 = arith.cmpi eq, %arg1, %c0_i32_7 : i32
    %15 = arith.extui %14 : i1 to i32
    %c0_i32_8 = arith.constant 0 : i32
    %16 = arith.cmpi ne, %15, %c0_i32_8 : i32
    scf.if %16 {
      %c0_9 = arith.constant 0 : index
      %c0_10 = arith.constant 0 : index
      %17 = vector.load %arg9[%c0_9, %c0_10] : memref<32x128xf32, #tpu.memory_space<vmem>>, vector<32x128xf32>
      %c0_11 = arith.constant 0 : index
      %c0_12 = arith.constant 0 : index
      %18 = vector.load %arg7[%c0_11, %c0_12] : memref<32x1xf32, #tpu.memory_space<vmem>>, vector<32x1xf32>
      %19 = vector.broadcast %18 : vector<32x1xf32> to vector<32x128xf32>
      %20 = arith.mulf %17, %19 : vector<32x128xf32>
      %21 = arith.truncf %20 : vector<32x128xf32> to vector<32x128xbf16>
      %c0_13 = arith.constant 0 : index
      %c0_14 = arith.constant 0 : index
      %22 = vector.load %arg4[%c0_13, %c0_14] : memref<32x128xbf16, #tpu.memory_space<vmem>>, vector<32x128xbf16>
      %23 = tpu.concatenate %21, %22 in 1 : vector<32x128xbf16>, vector<32x128xbf16> -> vector<32x256xbf16>
      %c0_15 = arith.constant 0 : index
      %c0_16 = arith.constant 0 : index
      %24 = vector.load %arg5[%c0_15, %c0_16] : memref<256x128xbf16, #tpu.memory_space<vmem>>, vector<256x128xbf16>
      %cst_17 = arith.constant dense<0.000000e+00> : vector<32x128xf32>
      %25 = tpu.matmul %23, %24, %cst_17 {dimension_numbers = #tpu.dot_dimension_numbers<[1], [0], [0], [1], [0, 0, 1, 1], [], []>} : vector<32x256xbf16>, vector<256x128xbf16>, vector<32x128xf32> -> vector<32x128xf32>
      %c0_18 = arith.constant 0 : index
      %c0_19 = arith.constant 0 : index
      %26 = vector.load %arg6[%c0_18, %c0_19] : memref<1x128xf32, #tpu.memory_space<vmem>>, vector<1x128xf32>
      %27 = vector.broadcast %26 : vector<1x128xf32> to vector<32x128xf32>
      %28 = arith.addf %25, %27 : vector<32x128xf32>
      %cst_20 = arith.constant 0.000000e+00 : f32
      %29 = vector.broadcast %cst_20 : f32 to vector<32x128xf32>
      %30 = arith.maximumf %28, %29 : vector<32x128xf32>
      %31 = arith.truncf %30 : vector<32x128xf32> to vector<32x128xbf16>
      %c0_21 = arith.constant 0 : index
      %c0_22 = arith.constant 0 : index
      %32 = vector.load %arg8[%c0_21, %c0_22] : memref<32x128xbf16, #tpu.memory_space<vmem>>, vector<32x128xbf16>
      tpu.vector_store %arg8[%c0_21, %c0_22], %31 {strides = array<i32>} : memref<32x128xbf16, #tpu.memory_space<vmem>>, vector<32x128xbf16>,
    } else {
    }
    return
  }
  func.func @transform_0(%arg0: i32, %arg1: i32) -> (i32, i32) {
    %c0_i32 = arith.constant 0 : i32
    return %arg0, %arg1 : i32, i32
  }
  func.func @transform_1(%arg0: i32, %arg1: i32) -> (i32, i32) {
    %c0_i32 = arith.constant 0 : i32
    %c0_i32_0 = arith.constant 0 : i32
    %c0_i32_1 = arith.constant 0 : i32
    return %c0_i32, %c0_i32_0 : i32, i32
  }
  func.func @transform_2(%arg0: i32, %arg1: i32) -> (i32, i32) {
    %c0_i32 = arith.constant 0 : i32
    %c0_i32_0 = arith.constant 0 : i32
    return %arg0, %c0_i32 : i32, i32
  }
  func.func @transform_3(%arg0: i32, %arg1: i32) -> (i32, i32) {
    %c0_i32 = arith.constant 0 : i32
    %c0_i32_0 = arith.constant 0 : i32
    %c0_i32_1 = arith.constant 0 : i32
    return %c0_i32, %c0_i32_0 : i32, i32
  }
  func.func @transform_4(%arg0: i32, %arg1: i32) -> (i32, i32) {
    %c0_i32 = arith.constant 0 : i32
    %c0_i32_0 = arith.constant 0 : i32
    %c0_i32_1 = arith.constant 0 : i32
    return %c0_i32, %c0_i32_0 : i32, i32
  }
  func.func @transform_5(%arg0: i32, %arg1: i32) -> (i32, i32) {
    %c0_i32 = arith.constant 0 : i32
    %c0_i32_0 = arith.constant 0 : i32
    return %arg0, %c0_i32 : i32, i32
  }
  func.func @transform_6(%arg0: i32, %arg1: i32) -> (i32, i32) {
    %c0_i32 = arith.constant 0 : i32
    %c0_i32_0 = arith.constant 0 : i32
    return %arg0, %c0_i32 : i32, i32
  }
}

module attributes {stable_mosaic.version = 11 : i64} {
  func.func @_sage_layer_kernel(%arg0: i32, %arg1: i32, %arg2: memref<32x128xi8, #tpu.memory_space<vmem>>, %arg3: memref<128x128xbf16, #tpu.memory_space<vmem>>, %arg4: memref<32x128xbf16, #tpu.memory_space<vmem>>, %arg5: memref<256x128xbf16, #tpu.memory_space<vmem>>, %arg6: memref<1x128xf32, #tpu.memory_space<vmem>>, %arg7: memref<32x1xf32, #tpu.memory_space<vmem>>, %arg8: memref<32x128xf32, #tpu.memory_space<vmem>>, %arg9: memref<32x128xf32, #tpu.memory_space<vmem>>) attributes {dimension_semantics = [#tpu.dimension_semantics<parallel>, #tpu.dimension_semantics<arbitrary>], iteration_bounds = array<i64: 1, 1>, scalar_prefetch = 0 : i64, scratch_operands = 1 : i64, tpu.core_type = #tpu.core_type<tc>, window_params = [{transform_indices = @transform_0, window_bounds = array<i64: 32, 128>}, {pipeline_mode = #tpu.pipeline_mode<synchronous>, transform_indices = @transform_1, window_bounds = array<i64: 128, 128>}, {transform_indices = @transform_2, window_bounds = array<i64: 32, 128>}, {pipeline_mode = #tpu.pipeline_mode<synchronous>, transform_indices = @transform_3, window_bounds = array<i64: 256, 128>}, {pipeline_mode = #tpu.pipeline_mode<synchronous>, transform_indices = @transform_4, window_bounds = array<i64: 1, 128>}, {transform_indices = @transform_5, window_bounds = array<i64: 32, 1>}, {transform_indices = @transform_6, window_bounds = array<i64: 32, 128>}]} {
    %c0_i32 = arith.constant 0 : i32
    %0 = arith.cmpi eq, %arg1, %c0_i32 : i32
    %1 = arith.extui %0 : i1 to i32
    %c0_i32_0 = arith.constant 0 : i32
    %2 = arith.cmpi ne, %1, %c0_i32_0 : i32
    scf.if %2 {
      %cst_9 = arith.constant 0.000000e+00 : f32
      %17 = vector.broadcast %cst_9 : f32 to vector<32x128xf32>
      %c0_10 = arith.constant 0 : index
      %c0_11 = arith.constant 0 : index
      %18 = vector.load %arg9[%c0_10, %c0_11] : memref<32x128xf32, #tpu.memory_space<vmem>>, vector<32x128xf32>
      tpu.vector_store %arg9[%c0_10, %c0_11], %17 {strides = array<i32>} : memref<32x128xf32, #tpu.memory_space<vmem>>, vector<32x128xf32>,
    } else {
    }
    %c0 = arith.constant 0 : index
    %c0_1 = arith.constant 0 : index
    %3 = vector.load %arg2[%c0, %c0_1] : memref<32x128xi8, #tpu.memory_space<vmem>>, vector<32x128xi8>
    %4 = arith.sitofp %3 : vector<32x128xi8> to vector<32x128xf32>
    %5 = arith.truncf %4 : vector<32x128xf32> to vector<32x128xbf16>
    %c128_i32 = arith.constant 128 : i32
    %6 = arith.muli %arg1, %c128_i32 : i32
    %7 = tpu.assume_multiple %6, 128 : i32
    %8 = arith.index_cast %7 : i32 to index
    %c0_2 = arith.constant 0 : index
    %9 = vector.load %arg3[%8, %c0_2] : memref<128x128xbf16, #tpu.memory_space<vmem>>, vector<128x128xbf16>
    %c0_3 = arith.constant 0 : index
    %c0_4 = arith.constant 0 : index
    %10 = vector.load %arg9[%c0_3, %c0_4] : memref<32x128xf32, #tpu.memory_space<vmem>>, vector<32x128xf32>
    %cst = arith.constant dense<0.000000e+00> : vector<32x128xf32>
    %11 = tpu.matmul %5, %9, %cst {dimension_numbers = #tpu.dot_dimension_numbers<[1], [0], [0], [1], [0, 0, 1, 1], [], []>} : vector<32x128xbf16>, vector<128x128xbf16>, vector<32x128xf32> -> vector<32x128xf32>
    %12 = arith.addf %10, %11 : vector<32x128xf32>
    %c0_5 = arith.constant 0 : index
    %c0_6 = arith.constant 0 : index
    %13 = vector.load %arg9[%c0_5, %c0_6] : memref<32x128xf32, #tpu.memory_space<vmem>>, vector<32x128xf32>
    tpu.vector_store %arg9[%c0_5, %c0_6], %12 {strides = array<i32>} : memref<32x128xf32, #tpu.memory_space<vmem>>, vector<32x128xf32>,
    %c0_i32_7 = arith.constant 0 : i32
    %14 = arith.cmpi eq, %arg1, %c0_i32_7 : i32
    %15 = arith.extui %14 : i1 to i32
    %c0_i32_8 = arith.constant 0 : i32
    %16 = arith.cmpi ne, %15, %c0_i32_8 : i32
    scf.if %16 {
      %c0_9 = arith.constant 0 : index
      %c0_10 = arith.constant 0 : index
      %17 = vector.load %arg9[%c0_9, %c0_10] : memref<32x128xf32, #tpu.memory_space<vmem>>, vector<32x128xf32>
      %c0_11 = arith.constant 0 : index
      %c0_12 = arith.constant 0 : index
      %18 = vector.load %arg7[%c0_11, %c0_12] : memref<32x1xf32, #tpu.memory_space<vmem>>, vector<32x1xf32>
      %19 = vector.broadcast %18 : vector<32x1xf32> to vector<32x128xf32>
      %20 = arith.mulf %17, %19 : vector<32x128xf32>
      %21 = arith.truncf %20 : vector<32x128xf32> to vector<32x128xbf16>
      %c0_13 = arith.constant 0 : index
      %c0_14 = arith.constant 0 : index
      %22 = vector.load %arg4[%c0_13, %c0_14] : memref<32x128xbf16, #tpu.memory_space<vmem>>, vector<32x128xbf16>
      %23 = tpu.concatenate %21, %22 in 1 : vector<32x128xbf16>, vector<32x128xbf16> -> vector<32x256xbf16>
      %c0_15 = arith.constant 0 : index
      %c0_16 = arith.constant 0 : index
      %24 = vector.load %arg5[%c0_15, %c0_16] : memref<256x128xbf16, #tpu.memory_space<vmem>>, vector<256x128xbf16>
      %cst_17 = arith.constant dense<0.000000e+00> : vector<32x128xf32>
      %25 = tpu.matmul %23, %24, %cst_17 {dimension_numbers = #tpu.dot_dimension_numbers<[1], [0], [0], [1], [0, 0, 1, 1], [], []>} : vector<32x256xbf16>, vector<256x128xbf16>, vector<32x128xf32> -> vector<32x128xf32>
      %c0_18 = arith.constant 0 : index
      %c0_19 = arith.constant 0 : index
      %26 = vector.load %arg6[%c0_18, %c0_19] : memref<1x128xf32, #tpu.memory_space<vmem>>, vector<1x128xf32>
      %27 = vector.broadcast %26 : vector<1x128xf32> to vector<32x128xf32>
      %28 = arith.addf %25, %27 : vector<32x128xf32>
      %cst_20 = arith.constant 0.000000e+00 : f32
      %29 = vector.broadcast %cst_20 : f32 to vector<32x128xf32>
      %30 = arith.maximumf %28, %29 : vector<32x128xf32>
      %c0_21 = arith.constant 0 : index
      %c0_22 = arith.constant 0 : index
      %31 = vector.load %arg8[%c0_21, %c0_22] : memref<32x128xf32, #tpu.memory_space<vmem>>, vector<32x128xf32>
      tpu.vector_store %arg8[%c0_21, %c0_22], %30 {strides = array<i32>} : memref<32x128xf32, #tpu.memory_space<vmem>>, vector<32x128xf32>,
    } else {
    }
    return
  }
  func.func @transform_0(%arg0: i32, %arg1: i32) -> (i32, i32) {
    %c0_i32 = arith.constant 0 : i32
    return %arg0, %arg1 : i32, i32
  }
  func.func @transform_1(%arg0: i32, %arg1: i32) -> (i32, i32) {
    %c0_i32 = arith.constant 0 : i32
    %c0_i32_0 = arith.constant 0 : i32
    %c0_i32_1 = arith.constant 0 : i32
    return %c0_i32, %c0_i32_0 : i32, i32
  }
  func.func @transform_2(%arg0: i32, %arg1: i32) -> (i32, i32) {
    %c0_i32 = arith.constant 0 : i32
    %c0_i32_0 = arith.constant 0 : i32
    return %arg0, %c0_i32 : i32, i32
  }
  func.func @transform_3(%arg0: i32, %arg1: i32) -> (i32, i32) {
    %c0_i32 = arith.constant 0 : i32
    %c0_i32_0 = arith.constant 0 : i32
    %c0_i32_1 = arith.constant 0 : i32
    return %c0_i32, %c0_i32_0 : i32, i32
  }
  func.func @transform_4(%arg0: i32, %arg1: i32) -> (i32, i32) {
    %c0_i32 = arith.constant 0 : i32
    %c0_i32_0 = arith.constant 0 : i32
    %c0_i32_1 = arith.constant 0 : i32
    return %c0_i32, %c0_i32_0 : i32, i32
  }
  func.func @transform_5(%arg0: i32, %arg1: i32) -> (i32, i32) {
    %c0_i32 = arith.constant 0 : i32
    %c0_i32_0 = arith.constant 0 : i32
    return %arg0, %c0_i32 : i32, i32
  }
  func.func @transform_6(%arg0: i32, %arg1: i32) -> (i32, i32) {
    %c0_i32 = arith.constant 0 : i32
    %c0_i32_0 = arith.constant 0 : i32
    return %arg0, %c0_i32 : i32, i32
  }
}

</mosaic_0001>

<bundles_post_ra>
// kernel: _encoder_forward_impl.3
= control target key start
LH: loop header
LB: loop body
LE: loop exit
PB: predicated region body
PF: predicated region fallthrough
CT: control target
= control target key end

     0   :  { %v549_v1 = vmov 0   ;;  %s702_s1 = inlined_call_operand.vmem [shape: bf16[128,128], index: 1, kind: input, shape index: {}]   ;;  %s703_s0 = inlined_call_operand.vmem [shape: s8[32,128], index: 0, kind: input, shape index: {}]   ;;  %s704_s5 = inlined_call_operand.vmem [shape: f32[32,1], index: 5, kind: input, shape index: {}]   ;;  %s705_s3 = inlined_call_operand.vmem [shape: bf16[256,128], index: 3, kind: input, shape index: {}]   ;;  %s706_s2 = inlined_call_operand.vmem [shape: bf16[32,128], index: 2, kind: input, shape index: {}]   ;;  %s707_s4 = inlined_call_operand.vmem [shape: f32[1,128], index: 4, kind: input, shape index: {}]   ;;  %s708_s6 = inlined_call_operand.vmem [shape: f32[32,128], index: 6, kind: output, shape index: {}]  }
   0x1   :  { %v523_v0 = vld [vmem:[%s702_s1] sm:$0xff]   ;;  %521 = vset.pattern.permute.xlu0 %v549_v1  ;;  %522 = vset.pattern.permute.xlu1 %v549_v1  ;;  %v524_v2 = vld [vmem:[%s702_s1 + $0x8] sm:$0xff]   ;;  %v525_v3 = vld [vmem:[%s702_s1 + $0x10] sm:$0xff]  }
   0x2   :  { %500 = vmatprep.subr.bf16.mxu0 %v523_v0  ;;  %v526_v4 = vld [vmem:[%s702_s1 + $0x18] sm:$0xff]   ;;  %v32_v5 = vld [vmem:[%s703_s0] sm:$0x3]  ;;  %v33_v6 = vld [vmem:[%s703_s0 + $0x2] sm:$0x3] }
   0x3   :  { %501 = vmatpush3.bf16.msra.mxu0 %v523_v0  ;;  %v36_v7 = vunpack.c.l.s8.bf16 %v32_v5  ;;  %v37_v8 = vunpack.c.l.s8.bf16 %v33_v6  ;;  %v189_v9 = vld [vmem:[%s704_s5] sm:$0xff]  ;;  %v191_v10 = vld [vmem:[%s704_s5 + $0x10] sm:$0xff]  ;;  %v190_v12 = vld [vmem:[%s704_s5 + $0x8] sm:$0xff] }
   0x4   :  { %502 = vmatprep.subr.bf16.mxu0 %v524_v2  ;;  %v527_v11 = vld [vmem:[%s702_s1 + $0x20] sm:$0xff]   ;;  %195 = vperm.xlu0 %521, %v189_v9   ;;  %v192_v13 = vld [vmem:[%s704_s5 + $0x18] sm:$0xff]  ;;  %v533_v17 = vld [vmem:[%s705_s3 + $0x48] sm:$0xff]  }
   0x5   :  { %205 = vperm.xlu1 %522, %v191_v10   ;;  %v433_v14 = vcombine.low %v36_v7, %v37_v8  ;;  %v531_v15 = vld [vmem:[%s705_s3 + $0x40] sm:$0xff]   ;;  %v528_v18 = vld [vmem:[%s702_s1 + $0x28] sm:$0xff]   ;;  %v535_v20 = vld [vmem:[%s705_s3 + $0x50] sm:$0xff]  }
   0x6   :  { %v532_v16 = vld [vmem:[%s705_s3] sm:$0xff]   ;;  %472 = vmatprep.subr.bf16.mxu1 %v531_v15  ;;  %v534_v19 = vld [vmem:[%s705_s3 + $0x8] sm:$0xff]   ;;  %v529_v21 = vld [vmem:[%s702_s1 + $0x30] sm:$0xff]  }
   0x7   :  { %503 = vmatpush3.bf16.msra.mxu0 %v524_v2  ;;  %516 = vmatprep.mubr.bf16.mxu0 %v433_v14  ;;  %v536_v22 = vld [vmem:[%s705_s3 + $0x10] sm:$0xff]   ;;  %v537_v23 = vld [vmem:[%s705_s3 + $0x58] sm:$0xff]   ;;  %v34_v24 = vld [vmem:[%s703_s0 + $0x4] sm:$0x3] }
   0x8   :  { %504 = vmatprep.subr.bf16.mxu0 %v525_v3  ;;  %200 = vperm.xlu0 %521, %v190_v12   ;;  %v35_v25 = vld [vmem:[%s703_s0 + $0x6] sm:$0x3]  ;;  %v538_v26 = vld [vmem:[%s705_s3 + $0x18] sm:$0xff]   ;;  %v38_v29 = vunpack.c.l.s8.bf16 %v34_v24  ;;  %v541_v32 = vld [vmem:[%s705_s3 + $0x68] sm:$0xff]  }
   0x9   :  { %210 = vperm.xlu1 %522, %v192_v13   ;;  %473 = vmatpush3.bf16.msra.mxu1 %v532_v16  ;;  %v530_v27 = vld [vmem:[%s702_s1 + $0x38] sm:$0xff]   ;;  %v539_v28 = vld [vmem:[%s705_s3 + $0x60] sm:$0xff]   ;;  %v39_v30 = vunpack.c.l.s8.bf16 %v35_v25  ;;  %v542_v34 = vld [vmem:[%s705_s3 + $0x28] sm:$0xff]  }
   0xa   :  { %474 = vmatprep.subr.bf16.mxu1 %v533_v17  ;;  %v540_v31 = vld [vmem:[%s705_s3 + $0x20] sm:$0xff]   ;;  %v543_v35 = vld [vmem:[%s705_s3 + $0x70] sm:$0xff]   ;;  %v545_v37 = vld [vmem:[%s705_s3 + $0x78] sm:$0xff]  }
   0xb   :  { %505 = vmatpush3.bf16.msra.mxu0 %v525_v3  ;;  %v434_v33 = vcombine.low %v38_v29, %v39_v30  ;;  %v544_v36 = vld [vmem:[%s705_s3 + $0x30] sm:$0xff]   ;;  %v546_v38 = vld [vmem:[%s705_s3 + $0x38] sm:$0xff]   ;;  %v547_v39 = vld [vmem:[%s706_s2] sm:$0xff]  }
   0xc   :  { %506 = vmatprep.subr.bf16.mxu0 %v526_v4  ;;  %402 = vmatprep.mubr.bf16.mxu1 %v547_v39  ;;  %v548_v53 = vld [vmem:[%s706_s2 + $0x8] sm:$0xff]   ;;  %v445_v56 = vld [vmem:[%s707_s4] ss:$0 sm:$0xff] }
   0xd   :  { %475 = vmatpush3.bf16.msra.mxu1 %v534_v19 }
   0xe   :  { %476 = vmatprep.subr.bf16.mxu1 %v535_v20 }
   0xf   :  { %507 = vmatpush3.bf16.msra.mxu0 %v526_v4 }
  0x10   :  { %508 = vmatprep.subr.bf16.mxu0 %v527_v11 }
  0x11   :  { %477 = vmatpush3.bf16.msra.mxu1 %v536_v22 }
  0x12   :  { %478 = vmatprep.subr.bf16.mxu1 %v537_v23 }
  0x13   :  { %509 = vmatpush3.bf16.msra.mxu0 %v527_v11 }
  0x14   :  { %510 = vmatprep.subr.bf16.mxu0 %v528_v18 }
  0x15   :  { %479 = vmatpush3.bf16.msra.mxu1 %v538_v26 }
  0x16   :  { %480 = vmatprep.subr.bf16.mxu1 %v539_v28 }
  0x17   :  { %511 = vmatpush3.bf16.msra.mxu0 %v528_v18 }
  0x18   :  { %512 = vmatprep.subr.bf16.mxu0 %v529_v21 }
  0x19   :  { %481 = vmatpush3.bf16.msra.mxu1 %v540_v31 }
  0x1a   :  { %482 = vmatprep.subr.bf16.mxu1 %v541_v32 }
  0x1b   :  { %513 = vmatpush3.bf16.msra.mxu0 %v529_v21 }
  0x1c   :  { %514 = vmatprep.subr.bf16.mxu0 %v530_v27 }
  0x1d   :  { %483 = vmatpush3.bf16.msra.mxu1 %v542_v34 }
  0x1e   :  { %484 = vmatprep.subr.bf16.mxu1 %v543_v35 }
  0x1f   :  { %515 = vmatpush3.bf16.msra.mxu0 %v530_v27 }
  0x21   :  { %485 = vmatpush3.bf16.msra.mxu1 %v544_v36 }
  0x22   :  { %517 = vmatmul.mubr.bf16.vlgmr.msra.gmra.mrb[0].mxu0 %v434_v33  ;;  %486 = vmatprep.subr.bf16.mxu1 %v545_v37 }
  0x25   :  { %487 = vmatpush3.bf16.msra.mxu1 %v546_v38 }
  0x83   :  { %v196_v41 = vpop.permute.xlu0 %195 }
  0x84   :  { %v206_v40 = vpop.permute.xlu1 %205 }
  0x87   :  { %v201_v46 = vpop.permute.xlu0 %200 }
  0x88   :  { %v211_v43 = vpop.permute.xlu1 %210 }
  0xf5   :  { %v518_v42 = vpop.f32.mrb[0].mxu0 }
  0xf6   :  { %v159_v44 = vpop.f32.mrb[1].mxu0  ;;  %v215_v47 = vmul.f32 %v518_v42, %v206_v40 }
  0xf7   :  { %v519_v45 = vpop.f32.mrb[2].mxu0  ;;  %v213_v50 = vmul.f32 %v196_v41, %v159_v44 }
  0xf8   :  { %v216_v48 = vmul.f32 %v519_v45, %v211_v43  ;;  %v162_v49 = vpop.f32.mrb[3].mxu0 }
  0xf9   :  { %v214_v51 = vmul.f32 %v201_v46, %v162_v49 }
  0xfa   :  { %v218_v52 = vpack.c.bf16 %v216_v48, %v215_v47 }
  0xfb   :  { %v217_v54 = vpack.c.bf16 %v214_v51, %v213_v50 }
  0xfd   :  { %403 = vmatmul.mubr.bf16.vlgmr.msra.gmra.mrb[0].mxu1 %v217_v54 }
  0xfe   :  { %410 = vmatprep.mubr.bf16.mxu1 %v548_v53 }
 0x105   :  { %411 = vmatmul.mubr.bf16.gmra.mrb[4].mxu1 %v218_v52 }
 0x1d0   :  { %v488_v55 = vpop.f32.mrb[0].mxu1 }
 0x1d1   :  { %v489_v57 = vpop.f32.mrb[1].mxu1 }
 0x1d2   :  { %v490_v58 = vadd.f32 %v489_v57, %v488_v55  ;;  %v491_v59 = vpop.f32.mrb[2].mxu1 }
 0x1d3   :  { %v492_v60 = vpop.f32.mrb[3].mxu1 }
 0x1d4   :  { %v405_v61 = vadd.f32 %v490_v58, %v445_v56  ;;  %v493_v62 = vadd.f32 %v492_v60, %v491_v59 }
 0x1d6   :  { %v419_v63 = vmax.f32 %v405_v61, 0.0  ;;  %v408_v0 = vadd.f32 %v493_v62, %v445_v56 }
 0x1d8   :  { %423 = vst [vmem:[%s708_s6] sm:$0xff] %v419_v63  ;;  %v420_v1 = vmax.f32 %v408_v0, 0.0  ;;  %v494_v2 = vpop.f32.mrb[4].mxu1 }
 0x1d9   :  { %v495_v3 = vpop.f32.mrb[5].mxu1 }
 0x1da   :  { %424 = vst [vmem:[%s708_s6 + $0x8] sm:$0xff] %v420_v1  ;;  %v496_v4 = vadd.f32 %v495_v3, %v494_v2  ;;  %v497_v5 = vpop.f32.mrb[6].mxu1 }
 0x1db   :  { %v498_v6 = vpop.f32.mrb[7].mxu1 }
 0x1dc   :  { %v413_v7 = vadd.f32 %v496_v4, %v445_v56  ;;  %v499_v8 = vadd.f32 %v498_v6, %v497_v5 }
 0x1de   :  { %v421_v9 = vmax.f32 %v413_v7, 0.0  ;;  %v416_v10 = vadd.f32 %v499_v8, %v445_v56 }
 0x1e0   :  { %425 = vst [vmem:[%s708_s6 + $0x10] sm:$0xff] %v421_v9  ;;  %v422_v11 = vmax.f32 %v416_v10, 0.0 }
 0x1e2   :  { %426 = vst [vmem:[%s708_s6 + $0x18] sm:$0xff] %v422_v11 }

// kernel: _encoder_forward_impl.2
= control target key start
LH: loop header
LB: loop body
LE: loop exit
PB: predicated region body
PF: predicated region fallthrough
CT: control target
= control target key end

     0   :  { %v584_v1 = vmov 0   ;;  %s731_s1 = inlined_call_operand.vmem [shape: bf16[128,128], index: 1, kind: input, shape index: {}]   ;;  %s732_s0 = inlined_call_operand.vmem [shape: s8[32,128], index: 0, kind: input, shape index: {}]   ;;  %s733_s5 = inlined_call_operand.vmem [shape: f32[32,1], index: 5, kind: input, shape index: {}]   ;;  %s734_s3 = inlined_call_operand.vmem [shape: bf16[256,128], index: 3, kind: input, shape index: {}]   ;;  %s735_s2 = inlined_call_operand.vmem [shape: bf16[32,128], index: 2, kind: input, shape index: {}]   ;;  %s736_s4 = inlined_call_operand.vmem [shape: f32[1,128], index: 4, kind: input, shape index: {}]   ;;  %s737_s6 = inlined_call_operand.vmem [shape: bf16[32,128], index: 6, kind: output, shape index: {}]  }
   0x1   :  { %v558_v0 = vld [vmem:[%s731_s1] sm:$0xff]   ;;  %556 = vset.pattern.permute.xlu0 %v584_v1  ;;  %557 = vset.pattern.permute.xlu1 %v584_v1  ;;  %v559_v2 = vld [vmem:[%s731_s1 + $0x8] sm:$0xff]   ;;  %v560_v3 = vld [vmem:[%s731_s1 + $0x10] sm:$0xff]  }
   0x2   :  { %535 = vmatprep.subr.bf16.mxu0 %v558_v0  ;;  %v561_v4 = vld [vmem:[%s731_s1 + $0x18] sm:$0xff]   ;;  %v32_v5 = vld [vmem:[%s732_s0] sm:$0x3]  ;;  %v33_v6 = vld [vmem:[%s732_s0 + $0x2] sm:$0x3] }
   0x3   :  { %536 = vmatpush3.bf16.msra.mxu0 %v558_v0  ;;  %v36_v7 = vunpack.c.l.s8.bf16 %v32_v5  ;;  %v37_v8 = vunpack.c.l.s8.bf16 %v33_v6  ;;  %v189_v9 = vld [vmem:[%s733_s5] sm:$0xff]  ;;  %v191_v10 = vld [vmem:[%s733_s5 + $0x10] sm:$0xff]  ;;  %v190_v12 = vld [vmem:[%s733_s5 + $0x8] sm:$0xff] }
   0x4   :  { %537 = vmatprep.subr.bf16.mxu0 %v559_v2  ;;  %v562_v11 = vld [vmem:[%s731_s1 + $0x20] sm:$0xff]   ;;  %195 = vperm.xlu0 %556, %v189_v9   ;;  %v192_v13 = vld [vmem:[%s733_s5 + $0x18] sm:$0xff]  ;;  %v568_v17 = vld [vmem:[%s734_s3 + $0x48] sm:$0xff]  }
   0x5   :  { %205 = vperm.xlu1 %557, %v191_v10   ;;  %v449_v14 = vcombine.low %v36_v7, %v37_v8  ;;  %v566_v15 = vld [vmem:[%s734_s3 + $0x40] sm:$0xff]   ;;  %v563_v18 = vld [vmem:[%s731_s1 + $0x28] sm:$0xff]   ;;  %v570_v20 = vld [vmem:[%s734_s3 + $0x50] sm:$0xff]  }
   0x6   :  { %v567_v16 = vld [vmem:[%s734_s3] sm:$0xff]   ;;  %507 = vmatprep.subr.bf16.mxu1 %v566_v15  ;;  %v569_v19 = vld [vmem:[%s734_s3 + $0x8] sm:$0xff]   ;;  %v564_v21 = vld [vmem:[%s731_s1 + $0x30] sm:$0xff]  }
   0x7   :  { %538 = vmatpush3.bf16.msra.mxu0 %v559_v2  ;;  %551 = vmatprep.mubr.bf16.mxu0 %v449_v14  ;;  %v571_v22 = vld [vmem:[%s734_s3 + $0x10] sm:$0xff]   ;;  %v572_v23 = vld [vmem:[%s734_s3 + $0x58] sm:$0xff]   ;;  %v34_v24 = vld [vmem:[%s732_s0 + $0x4] sm:$0x3] }
   0x8   :  { %539 = vmatprep.subr.bf16.mxu0 %v560_v3  ;;  %200 = vperm.xlu0 %556, %v190_v12   ;;  %v35_v25 = vld [vmem:[%s732_s0 + $0x6] sm:$0x3]  ;;  %v573_v26 = vld [vmem:[%s734_s3 + $0x18] sm:$0xff]   ;;  %v38_v29 = vunpack.c.l.s8.bf16 %v34_v24  ;;  %v576_v32 = vld [vmem:[%s734_s3 + $0x68] sm:$0xff]  }
   0x9   :  { %210 = vperm.xlu1 %557, %v192_v13   ;;  %508 = vmatpush3.bf16.msra.mxu1 %v567_v16  ;;  %v565_v27 = vld [vmem:[%s731_s1 + $0x38] sm:$0xff]   ;;  %v574_v28 = vld [vmem:[%s734_s3 + $0x60] sm:$0xff]   ;;  %v39_v30 = vunpack.c.l.s8.bf16 %v35_v25  ;;  %v577_v34 = vld [vmem:[%s734_s3 + $0x28] sm:$0xff]  }
   0xa   :  { %509 = vmatprep.subr.bf16.mxu1 %v568_v17  ;;  %v575_v31 = vld [vmem:[%s734_s3 + $0x20] sm:$0xff]   ;;  %v578_v35 = vld [vmem:[%s734_s3 + $0x70] sm:$0xff]   ;;  %v580_v37 = vld [vmem:[%s734_s3 + $0x78] sm:$0xff]  }
   0xb   :  { %540 = vmatpush3.bf16.msra.mxu0 %v560_v3  ;;  %v450_v33 = vcombine.low %v38_v29, %v39_v30  ;;  %v579_v36 = vld [vmem:[%s734_s3 + $0x30] sm:$0xff]   ;;  %v581_v38 = vld [vmem:[%s734_s3 + $0x38] sm:$0xff]   ;;  %v582_v39 = vld [vmem:[%s735_s2] sm:$0xff]  }
   0xc   :  { %541 = vmatprep.subr.bf16.mxu0 %v561_v4  ;;  %402 = vmatprep.mubr.bf16.mxu1 %v582_v39  ;;  %v583_v53 = vld [vmem:[%s735_s2 + $0x8] sm:$0xff]   ;;  %v461_v56 = vld [vmem:[%s736_s4] ss:$0 sm:$0xff] }
   0xd   :  { %510 = vmatpush3.bf16.msra.mxu1 %v569_v19 }
   0xe   :  { %511 = vmatprep.subr.bf16.mxu1 %v570_v20 }
   0xf   :  { %542 = vmatpush3.bf16.msra.mxu0 %v561_v4 }
  0x10   :  { %543 = vmatprep.subr.bf16.mxu0 %v562_v11 }
  0x11   :  { %512 = vmatpush3.bf16.msra.mxu1 %v571_v22 }
  0x12   :  { %513 = vmatprep.subr.bf16.mxu1 %v572_v23 }
  0x13   :  { %544 = vmatpush3.bf16.msra.mxu0 %v562_v11 }
  0x14   :  { %545 = vmatprep.subr.bf16.mxu0 %v563_v18 }
  0x15   :  { %514 = vmatpush3.bf16.msra.mxu1 %v573_v26 }
  0x16   :  { %515 = vmatprep.subr.bf16.mxu1 %v574_v28 }
  0x17   :  { %546 = vmatpush3.bf16.msra.mxu0 %v563_v18 }
  0x18   :  { %547 = vmatprep.subr.bf16.mxu0 %v564_v21 }
  0x19   :  { %516 = vmatpush3.bf16.msra.mxu1 %v575_v31 }
  0x1a   :  { %517 = vmatprep.subr.bf16.mxu1 %v576_v32 }
  0x1b   :  { %548 = vmatpush3.bf16.msra.mxu0 %v564_v21 }
  0x1c   :  { %549 = vmatprep.subr.bf16.mxu0 %v565_v27 }
  0x1d   :  { %518 = vmatpush3.bf16.msra.mxu1 %v577_v34 }
  0x1e   :  { %519 = vmatprep.subr.bf16.mxu1 %v578_v35 }
  0x1f   :  { %550 = vmatpush3.bf16.msra.mxu0 %v565_v27 }
  0x21   :  { %520 = vmatpush3.bf16.msra.mxu1 %v579_v36 }
  0x22   :  { %552 = vmatmul.mubr.bf16.vlgmr.msra.gmra.mrb[0].mxu0 %v450_v33  ;;  %521 = vmatprep.subr.bf16.mxu1 %v580_v37 }
  0x25   :  { %522 = vmatpush3.bf16.msra.mxu1 %v581_v38 }
  0x83   :  { %v196_v41 = vpop.permute.xlu0 %195 }
  0x84   :  { %v206_v40 = vpop.permute.xlu1 %205 }
  0x87   :  { %v201_v46 = vpop.permute.xlu0 %200 }
  0x88   :  { %v211_v43 = vpop.permute.xlu1 %210 }
  0xf5   :  { %v553_v42 = vpop.f32.mrb[0].mxu0 }
  0xf6   :  { %v159_v44 = vpop.f32.mrb[1].mxu0  ;;  %v215_v47 = vmul.f32 %v553_v42, %v206_v40 }
  0xf7   :  { %v554_v45 = vpop.f32.mrb[2].mxu0  ;;  %v213_v50 = vmul.f32 %v196_v41, %v159_v44 }
  0xf8   :  { %v216_v48 = vmul.f32 %v554_v45, %v211_v43  ;;  %v162_v49 = vpop.f32.mrb[3].mxu0 }
  0xf9   :  { %v214_v51 = vmul.f32 %v201_v46, %v162_v49 }
  0xfa   :  { %v218_v52 = vpack.c.bf16 %v216_v48, %v215_v47 }
  0xfb   :  { %v217_v54 = vpack.c.bf16 %v214_v51, %v213_v50 }
  0xfd   :  { %403 = vmatmul.mubr.bf16.vlgmr.msra.gmra.mrb[0].mxu1 %v217_v54 }
  0xfe   :  { %410 = vmatprep.mubr.bf16.mxu1 %v583_v53 }
 0x105   :  { %411 = vmatmul.mubr.bf16.gmra.mrb[4].mxu1 %v218_v52 }
 0x1d0   :  { %v523_v55 = vpop.f32.mrb[0].mxu1 }
 0x1d1   :  { %v524_v57 = vpop.f32.mrb[1].mxu1 }
 0x1d2   :  { %v525_v58 = vadd.f32 %v524_v57, %v523_v55  ;;  %v526_v59 = vpop.f32.mrb[2].mxu1 }
 0x1d3   :  { %v527_v60 = vpop.f32.mrb[3].mxu1 }
 0x1d4   :  { %v405_v61 = vadd.f32 %v525_v58, %v461_v56  ;;  %v528_v62 = vadd.f32 %v527_v60, %v526_v59 }
 0x1d6   :  { %v408_v63 = vadd.f32 %v528_v62, %v461_v56  ;;  %v419_v0 = vmax.f32 %v405_v61, 0.0 }
 0x1d8   :  { %v420_v1 = vmax.f32 %v408_v63, 0.0  ;;  %v529_v2 = vpop.f32.mrb[4].mxu1 }
 0x1d9   :  { %v530_v3 = vpop.f32.mrb[5].mxu1 }
 0x1da   :  { %v489_v4 = vpack.c.bf16 %v420_v1, %v419_v0  ;;  %v531_v5 = vadd.f32 %v530_v3, %v529_v2  ;;  %v532_v6 = vpop.f32.mrb[6].mxu1 }
 0x1db   :  { %v533_v7 = vpop.f32.mrb[7].mxu1 }
 0x1dc   :  { %490 = vst [vmem:[%s737_s6] sm:$0xff] %v489_v4   ;;  %v413_v8 = vadd.f32 %v531_v5, %v461_v56  ;;  %v534_v9 = vadd.f32 %v533_v7, %v532_v6 }
 0x1de   :  { %v416_v10 = vadd.f32 %v534_v9, %v461_v56  ;;  %v421_v11 = vmax.f32 %v413_v8, 0.0 }
 0x1e0   :  { %v422_v12 = vmax.f32 %v416_v10, 0.0 }
 0x1e2   :  { %v494_v13 = vpack.c.bf16 %v422_v12, %v421_v11 }
 0x1e4   :  { %496 = vst [vmem:[%s737_s6 + $0x8] sm:$0xff] %v494_v13  }

</bundles_post_ra>
